<compile_context>
chip_gen: v7x
topology: tpu7x:2x2x1
jax: 0.10.0
libtpu: 0.0.40
codegen_flags: <defaults>
</compile_context>

<pallas_src>
import functools

import jax
import jax.numpy as jnp
from jax.experimental import pallas as pl
from jax.experimental.pallas import tpu as pltpu


def _round_up(n: int, m: int) -> int:
    return ((n + m - 1) // m) * m


def _cdiv(a: int, b: int) -> int:
    return (a + b - 1) // b


_VMEM_PIPELINE_BUDGET = 24 * 1024 * 1024  # pipeline buffers budget (all gens)
_VMEM_LIMIT_BYTES = 32 * 1024 * 1024      # > v5e default 16 MiB, < v7x physical 64 MiB


def _linear_encoder_kernel(x_ref, w_ref, b_ref, o_ref, *, compute_dtype):
    x = x_ref[...]
    if x.dtype != compute_dtype:
        # In-kernel downcast: avoids a separate XLA cast pass over x in HBM.
        x = x.astype(compute_dtype)
    # MXU matmul with f32 accumulation; bias add + final cast in an f32 epilogue.
    acc = jnp.dot(x, w_ref[...], preferred_element_type=jnp.float32)
    o_ref[...] = (acc + b_ref[...]).astype(o_ref.dtype)


def _choose_batch_tile(B, F, Lp, x_isz, w_isz, out_isz, user_tile):
    """Pick a batch tile (multiple of 8) from a VMEM budget + grid-balance rules."""
    if user_tile is not None:
        tile = _round_up(max(8, int(user_tile)), 8)      # enforce (8,128) rule
        return min(tile, _round_up(B, 8))
    fixed = 2 * (F * Lp * w_isz + Lp * 4)                # W + bias, double-buffered
    per_row = 2 * (F * x_isz + Lp * out_isz)             # x tile + out tile, double-buffered
    max_rows = max(8, (_VMEM_PIPELINE_BUDGET - fixed) // per_row)
    max_rows = min((max_rows // 8) * 8, 2048)
    b8 = _round_up(B, 8)
    if b8 <= max_rows:
        # Small batch: keep >= 2 grid steps so both v7x TensorCores get work.
        return _round_up(_cdiv(B, 2), 8) if b8 >= 16 else b8
    n_steps = _cdiv(b8, max_rows)
    if n_steps % 2:
        n_steps += 1  # even step count balances the two-core v7x megacore
    return _round_up(_cdiv(B, n_steps), 8)


def linear_encoder_forward(x, w, b, *, batch_tile=None,
                           compute_dtype=jnp.float32, out_dtype=None):
    """y = x @ w + b.

    w is stored pre-transposed as [feature, latent]; b as [1, latent] (or [latent]).
    compute_dtype=f32 (default) reproduces PyTorch fc(x) exactly; pass
    jnp.bfloat16 to halve weight traffic / MXU cost (f32 accumulation kept).
    """
    B, F = x.shape
    Fw, L = w.shape
    assert Fw == F, "weight must be [feature, latent]"
    out_dtype = x.dtype if out_dtype is None else out_dtype

    # Lane-dense output: pad the latent dim to one 128-lane tile (never more).
    Lp = _round_up(L, 128)
    w_p = w.astype(compute_dtype)
    b_p = b.reshape(1, L).astype(jnp.float32)
    if Lp != L:
        w_p = jnp.pad(w_p, ((0, 0), (0, Lp - L)))
        b_p = jnp.pad(b_p, ((0, 0), (0, Lp - L)))

    x_isz = jnp.dtype(x.dtype).itemsize
    w_isz = jnp.dtype(compute_dtype).itemsize
    o_isz = jnp.dtype(out_dtype).itemsize
    tile = _choose_batch_tile(B, F, Lp, x_isz, w_isz, o_isz, batch_tile)
    grid = (_cdiv(B, tile),)  # ragged last block: reads clipped, stores masked

    cost = pl.CostEstimate(
        flops=2 * B * F * Lp,
        transcendentals=0,
        bytes_accessed=B * F * x_isz + F * Lp * w_isz + Lp * 4 + B * Lp * o_isz,
    )

    kernel = functools.partial(_linear_encoder_kernel, compute_dtype=compute_dtype)

    out = pl.pallas_call(
        kernel,
        out_shape=jax.ShapeDtypeStruct((B, Lp), out_dtype),
        grid=grid,
        in_specs=[
            pl.BlockSpec((tile, F), lambda i: (i, 0)),   # x: one fat batch tile per step
            pl.BlockSpec((F, Lp), lambda i: (0, 0)),     # W: grid-invariant
            pl.BlockSpec((1, Lp), lambda i: (0, 0)),     # bias: grid-invariant, f32
        ],
        out_specs=pl.BlockSpec((tile, Lp), lambda i: (i, 0)),
        compiler_params=pltpu.CompilerParams(
            dimension_semantics=("parallel",),
            vmem_limit_bytes=_VMEM_LIMIT_BYTES,
        ),
        cost_estimate=cost,
    )(x, w_p, b_p)

    return out if Lp == L else out[:, :L]


def linear_encoder_forward_variational(x, w_mu, b_mu, w_var, b_var, **kw):
    """Variational path: fuse fc_mu / fc_var into one matmul via column concat."""
    L = w_mu.shape[1]
    w = jnp.concatenate([w_mu, w_var], axis=1)
    b = jnp.concatenate([b_mu.reshape(1, -1), b_var.reshape(1, -1)], axis=1)
    y = linear_encoder_forward(x, w, b, **kw)
    return y[:, :L], y[:, L:]


if __name__ == "__main__":
    latent_dimensions = 32
    feature_size = 784
    batch = 100  # deliberately not a multiple of 8/tile: exercises the ragged last block

    key = jax.random.PRNGKey(0)
    kx, kw, kb, kw2, kb2 = jax.random.split(key, 5)

    x = jax.random.normal(kx, (batch, feature_size), jnp.float32)
    # torch.nn.Linear default init; weight stored pre-transposed to [in, out].
    bound = 1.0 / float(feature_size) ** 0.5
    w = jax.random.uniform(kw, (feature_size, latent_dimensions), jnp.float32, -bound, bound)
    b = jax.random.uniform(kb, (1, latent_dimensions), jnp.float32, -bound, bound)

    ref = x @ w + b

    # Default path: f32 operands — exact PyTorch fc(x) semantics.
    out = jax.block_until_ready(linear_encoder_forward(x, w, b))
    assert out.shape == (batch, latent_dimensions)
    assert jnp.allclose(out, ref, atol=1e-5, rtol=1e-5)

    # Opt-in bf16 operand path (f32 accumulation): the bandwidth-saving config.
    out_bf16 = jax.block_until_ready(
        linear_encoder_forward(x, w, b, compute_dtype=jnp.bfloat16))
    assert jnp.allclose(out_bf16, ref, atol=5e-2, rtol=5e-2)

    # Variational path: (mu, logvar) fused into a single kernel call.
    w_var = jax.random.uniform(kw2, (feature_size, latent_dimensions), jnp.float32, -bound, bound)
    b_var = jax.random.uniform(kb2, (1, latent_dimensions), jnp.float32, -bound, bound)
    mu, logvar = jax.block_until_ready(
        linear_encoder_forward_variational(x, w, b, w_var, b_var))
    assert jnp.allclose(mu, ref, atol=1e-5, rtol=1e-5)
    assert jnp.allclose(logvar, x @ w_var + b_var, atol=1e-5, rtol=1e-5)

    print("KERNEL_OK")
</pallas_src>

<mosaic_0001>
module attributes {stable_mosaic.version = 11 : i64} {
  func.func @_linear_encoder_kernel(%arg0: i32, %arg1: memref<56x784xf32, #tpu.memory_space<vmem>>, %arg2: memref<784x128xf32, #tpu.memory_space<vmem>>, %arg3: memref<1x128xf32, #tpu.memory_space<vmem>>, %arg4: memref<56x128xf32, #tpu.memory_space<vmem>>) attributes {dimension_semantics = [#tpu.dimension_semantics<parallel>], iteration_bounds = array<i64: 2>, scalar_prefetch = 0 : i64, scratch_operands = 0 : i64, tpu.core_type = #tpu.core_type<tc>, window_params = [{transform_indices = @transform_0, window_bounds = array<i64: 56, 784>}, {pipeline_mode = #tpu.pipeline_mode<synchronous>, transform_indices = @transform_1, window_bounds = array<i64: 784, 128>}, {pipeline_mode = #tpu.pipeline_mode<synchronous>, transform_indices = @transform_2, window_bounds = array<i64: 1, 128>}, {transform_indices = @transform_3, window_bounds = array<i64: 56, 128>}]} {
    %c0 = arith.constant 0 : index
    %c0_0 = arith.constant 0 : index
    %0 = vector.load %arg1[%c0, %c0_0] : memref<56x784xf32, #tpu.memory_space<vmem>>, vector<56x784xf32>
    %c0_1 = arith.constant 0 : index
    %c0_2 = arith.constant 0 : index
    %1 = vector.load %arg2[%c0_1, %c0_2] : memref<784x128xf32, #tpu.memory_space<vmem>>, vector<784x128xf32>
    %cst = arith.constant dense<0.000000e+00> : vector<56x128xf32>
    %2 = tpu.matmul %0, %1, %cst {dimension_numbers = #tpu.dot_dimension_numbers<[1], [0], [0], [1], [0, 0, 1, 1], [], []>} : vector<56x784xf32>, vector<784x128xf32>, vector<56x128xf32> -> vector<56x128xf32>
    %c0_3 = arith.constant 0 : index
    %c0_4 = arith.constant 0 : index
    %3 = vector.load %arg3[%c0_3, %c0_4] : memref<1x128xf32, #tpu.memory_space<vmem>>, vector<1x128xf32>
    %4 = vector.broadcast %3 : vector<1x128xf32> to vector<56x128xf32>
    %5 = arith.addf %2, %4 : vector<56x128xf32>
    %c0_5 = arith.constant 0 : index
    %c0_6 = arith.constant 0 : index
    %6 = vector.load %arg4[%c0_5, %c0_6] : memref<56x128xf32, #tpu.memory_space<vmem>>, vector<56x128xf32>
    tpu.vector_store %arg4[%c0_5, %c0_6], %5 {strides = array<i32>} : memref<56x128xf32, #tpu.memory_space<vmem>>, vector<56x128xf32>,
    return
  }
  func.func @transform_0(%arg0: i32) -> (i32, i32) {
    %c0_i32 = arith.constant 0 : i32
    %c0_i32_0 = arith.constant 0 : i32
    return %arg0, %c0_i32 : i32, i32
  }
  func.func @transform_1(%arg0: i32) -> (i32, i32) {
    %c0_i32 = arith.constant 0 : i32
    %c0_i32_0 = arith.constant 0 : i32
    %c0_i32_1 = arith.constant 0 : i32
    return %c0_i32, %c0_i32_0 : i32, i32
  }
  func.func @transform_2(%arg0: i32) -> (i32, i32) {
    %c0_i32 = arith.constant 0 : i32
    %c0_i32_0 = arith.constant 0 : i32
    %c0_i32_1 = arith.constant 0 : i32
    return %c0_i32, %c0_i32_0 : i32, i32
  }
  func.func @transform_3(%arg0: i32) -> (i32, i32) {
    %c0_i32 = arith.constant 0 : i32
    %c0_i32_0 = arith.constant 0 : i32
    return %arg0, %c0_i32 : i32, i32
  }
}

</mosaic_0001>

<bundles_post_ra>
// kernel: tpu_custom_call.1
= control target key start
LH: loop header
LB: loop body
LE: loop exit
PB: predicated region body
PF: predicated region fallthrough
CT: control target
= control target key end

     0   :  { %8 = vsyncpa [#allocation3], 0  ;;  %s1743_s0 = inlined_call_operand.hbm [shape: f32[100,784], index: 0, kind: input, shape index: {}]   ;;  %s1744_s1 = inlined_call_operand.hbm [shape: f32[784,128], index: 1, kind: input, shape index: {}]   ;;  %s1745_s2 = inlined_call_operand.vmem [shape: f32[1,128], index: 2, kind: input, shape index: {}]   ;;  %s1746_s3 = inlined_call_operand.hbm [shape: f32[100,128], index: 3, kind: output, shape index: {}]  }
   0x1   :  { %10 = vsyncpa [#allocation3 + $0x1], 0 }
   0x2   :  { %11 = vsyncpa [#allocation6], 0 }
   0x3   :  { %12 = vsyncpa [#allocation4], 0 }
   0x4   :  { %14 = vsyncpa [#allocation4 + $0x1], 0  ;;  %s1452_s12 = smov 0   ;;  %s1454_s13 = smov 0  }
   0x5   :  { %s1456_s14 = smov 0   ;;  %s1458_s15 = smov 0  }
   0x6 LB: > { %s1473_s16 = sadd.s32 4294967295, %s1418_s15   ;;  %s909_s17 = sadd.s32 4294967294, %s1418_s15   ;;  %s1418_s15 = sphi %s1458_s15, %s1766_s15   ;;  %s1414_s14 = sphi %s1456_s14, %s1765_s14   ;;  %s1410_s13 = sphi %s1454_s13, %s1764_s13   ;;  %s1406_s12 = sphi %s1452_s12, %s1763_s12  }
   0x7   : > { %s1477_s18 = sadd.s32 1, %s1418_s15   ;;  %s27_s19 = sadd.s32 1, %s1414_s14 }
   0x8   : > { %s24_s20 = ssub.s32 %s1418_s15, %s1477_s18  ;;  %p34_p0 = scmp.ne.s32.totalorder %s1414_s14, %s1410_s13 }
   0x9   : > { %p25_p1 = scmp.eq.s32.totalorder %s24_s20, 0  ;;  %p35_p2 = scmp.eq.s32.totalorder %s1418_s15, 0 }
   0xa   : > { %p40_p3 = scmp.ne.s32.totalorder %s1410_s13, %s1406_s12  ;;  %p1747_p4 = scmp.eq.s32.totalorder %s1473_s16, 0 }
   0xb   : > { %s1489_s21 = scalar_select %p25_p1, %s1414_s14, %s27_s19  }
   0xc   : > { %p1491_p5 = por %p35_p2, %p34_p0  ;;  %p1497_p6 = por %p1747_p4, %p40_p3 }
   0xd   : > { %p106_p7 = scmp.eq.s32.totalorder %s1473_s16, 1  ;;  %p112_p8 = scmp.eq.s32.totalorder %s909_s17, 1 }
   0xe   : > { %s1750_s22 = scalar_select %p1491_p5, 1, 0 }
   0xf   : > { %s1751_s23 = scalar_select %p1497_p6, 1, 0 }
  0x10   : > { %p910_p9 = scmp.ge.s32.totalorder %s1418_s15, 1  ;;  %p119_p10 = scmp.lt.s32.totalorder %s1418_s15, 3 }
  0x11   : > { %p1504_p11 = por %p106_p7, %p34_p0  ;;  %p1508_p12 = por %p112_p8, %p40_p3 }
  0x12   : > { %p1512_p13 = pnand %p910_p9, %p119_p10  ;;  %s1420_s27 = smov [#allocation5]  }
  0x13   : > { %s1752_s24 = scalar_select %p1504_p11, 1, 0 }
  0x14   : > { %s1753_s25 = scalar_select %p1508_p12, 1, 0 }
  0x15   : > { %s1754_s26 = scalar_select %p1512_p13, 1, 0 }
  0x16   : > { %p1238_p1 = pneg %p1512_p13  ;;  %s131_s28 = sshll.u32 %s1420_s27, 4  ;;  %s132_s28 = int_to_ptr.vmem [resolvable:$true] %s131_s28 }
  0x17   : > { %s1292_s5 = scalar_lea.hbm %s1744_s1, 12544 }
  0x18   : > { %p1520_p2 = pnand %p1238_p1, %p1747_p4  ;;  %p1293_p0 = scmp.ne.s32.totalorder %s1744_s1, %s1292_s5 }
  0x19   : > { %p1299_p9 = scmp.lt.u32.totalorder %s1292_s5, %s1744_s1 }
  0x1a   : > { %p1294_p3 = pneg %p1520_p2 }
  0x1c   : > { %p1295_p7 = pnand %p1294_p3, %p1293_p0 }
  0x1e   : > { %p1296_p8 = pneg %p1295_p7 }
  0x20   : > { %p1301_p10 = pnand %p1299_p9, %p1296_p8 }
  0x22   : > { %1304 = shalt.err (!%p1301_p10)
}
  0x23   : > { %s1305_s10 = scalar_lea.vmem %s132_s28, 12544  ;;  %p1313_p11 = scmp.lt.s32.totalorder %s132_s28, %s132_s28 }
  0x24   : > { %p1306_p1 = scmp.ne.s32.totalorder %s132_s28, %s1305_s10  ;;  %p1314_p6 = scmp.lt.s32.totalorder %s1305_s10, %s1305_s10 }
  0x26   : > { %p1308_p4 = pnand %p1306_p1, %p1294_p3  ;;  %p1315_p13 = por %p1314_p6, %p1313_p11 }
  0x28   : > { %p1309_p12 = pneg %p1308_p4 }
  0x2a   : > { %p1316_p5 = pnand %p1315_p13, %p1309_p12 }
  0x2c   : > { %1319 = shalt.err (!%p1316_p5)
}
  0x2d   : > { %s1421_s11 = smov 128   ;;  %s1422_s17 = smov 8  }
  0x2e   : > { %1241 = dma.hbm_to_vmem [thread:$0]  (!%p1520_p2), %s1744_s1, 12544, %s132_s28, [#allocation6], %s1421_s11, %s1421_s11, %s1422_s17  }
  0x2f   : > { %p912_p0 = scmp.ge.s32.totalorder %s1418_s15, 2 }
  0x30   : > { %p1756_p4 = scmp.ne.s32.totalorder (!%p912_p0), %s1750_s22, 0 }
  0x31   : > { %144 = sbr.rel (%p912_p0) target bundleno = 92 (0x5c), region = 24 }
  0x38   : > { %147 = sbr.rel (!%p1756_p4) target bundleno = 92 (0x5c), region = 28  ;;  %s148_s27 = sand.u32 (%p1756_p4), 1, %s1414_s14  }
  0x39   : > { %s153_s30 = smul.u32 (%p1756_p4), 7, %s1418_s15  ;;  %s1550_s6 = scalar_lea.sflag (%p1756_p4), [#allocation3], %s148_s27 }
  0x3a   : > { %s1228_s4 = smul.u32 (%p1756_p4), 392, %s148_s27 }
  0x3b   : > { %s154_s5 = ssub.s32 (%p1756_p4), 13, %s153_s30 }
  0x3c   : > { %p155_p5 = scmp.lt.s32.totalorder (%p1756_p4), %s154_s5, 7  ;;  %s152_s7 = scalar_lea.vmem (%p1756_p4), [#allocation2], %s1228_s4 }
  0x3f   : > { %s1768_s5 = smov (!%p155_p5, %s154_s5), 7 }
  0x40   : > { %s1547_s29 = smul.u32 896, %s1768_s5 }
  0x42   : > { %s160_s28 = ssub.s32 6272, %s1547_s29 }
  0x43   : > { %161 = vsyncadd %s1550_s6, %s160_s28  ;;  %p915_p6 = scmp.ne.s32.totalorder %s1547_s29, 0  ;;  %s1247_s22 = smul.u32 6272, %s1418_s15 }
  0x44   : > { %s167_s8 = sshll.u32 %s152_s7, 4  ;;  %s1324_s27 = scalar_lea.hbm %s1743_s0, 11648  ;;  %s1560_s8 = int_to_ptr.vmem [resolvable:$true] %s167_s8 }
  0x45   : > { %s1558_s11 = scalar_lea.hbm %s1743_s0, %s1247_s22 }
  0x46   : > { %s1320_s17 = scalar_lea.hbm %s1558_s11, %s1547_s29  ;;  %p1325_p2 = scmp.lt.u32.totalorder %s1558_s11, %s1743_s0 }
  0x47   : > { %p1321_p11 = scmp.ne.s32.totalorder %s1558_s11, %s1320_s17  ;;  %p1326_p3 = scmp.lt.u32.totalorder %s1324_s27, %s1320_s17 }
  0x48   : > { %p1328_p8 = scmp.lt.u32.totalorder %s1320_s17, %s1558_s11 }
  0x49   : > { %p1322_p12 = pnand %p1321_p11, %p915_p6  ;;  %p1327_p7 = por %p1326_p3, %p1325_p2 }
  0x4b   : > { %p1323_p13 = pneg %p1322_p12  ;;  %p1329_p9 = por %p1328_p8, %p1327_p7 }
  0x4d   : > { %p1330_p10 = pnand %p1329_p9, %p1323_p13 }
  0x4f   : > { %1333 = shalt.err (!%p1330_p10)
}
  0x50   : > { %s1334_s5 = scalar_lea.vmem %s1560_s8, %s1547_s29  ;;  %s1423_s28 = smov [#allocation2]  }
  0x51   : > { %p1335_p1 = scmp.ne.s32.totalorder %s1560_s8, %s1334_s5  ;;  %s1338_s7 = sshll.u32 %s1423_s28, 4  ;;  %s1339_s7 = int_to_ptr.vmem [resolvable:$false] %s1338_s7 }
  0x52   : > { %s1340_s22 = scalar_lea.vmem %s1339_s7, 12544  ;;  %p1341_p11 = scmp.lt.s32.totalorder %s1560_s8, %s1339_s7 }
  0x53   : > { %p1336_p4 = pnand %p1335_p1, %p915_p6  ;;  %p1342_p12 = scmp.lt.s32.totalorder %s1340_s22, %s1334_s5 }
  0x55   : > { %p1337_p5 = pneg %p1336_p4  ;;  %p1343_p2 = por %p1342_p12, %p1341_p11 }
  0x57   : > { %p1344_p3 = pnand %p1343_p2, %p1337_p5 }
  0x59   : > { %1347 = shalt.err (!%p1344_p3)
}
  0x5a   : > { %s1424_s9 = smov 896   ;;  %s1425_s10 = smov 56  }
  0x5b   : > { %173 = dma.hbm_to_vmem [thread:$0]  (%p915_p6), %s1558_s11, %s1547_s29, %s1560_s8, %s1550_s6, %s1424_s9, %s1424_s9, %s1425_s10  }
  0x5c PF: > { %p1757_p13 = scmp.ne.s32.totalorder %s1754_s26, 0 }
  0x5d   : > { %s1590_s17 = sand.u32 (!%p1757_p13), 1, %s1410_s13   ;;  %p1758_p7 = scmp.ne.s32.totalorder (!%p1757_p13), %s1751_s23, 0 }
  0x5e   : > { %179 = sbr.rel (%p1757_p13) target bundleno = 444 (0x1bc), region = 32  ;;  %s182_s20 = scalar_lea.sflag (!%p1757_p13), [#allocation3], %s1590_s17 }
  0x5f   : > { %s1230_s19 = smul.u32 (!%p1757_p13), 392, %s1590_s17 }
  0x61   : > { %s1594_s27 = scalar_lea.vmem (!%p1757_p13), [#allocation2], %s1230_s19 }
  0x65   : > { %1393 = dma.done.wait (%p1758_p7), %s182_s20, 6272  }
  0x66   : > { %1395 = vsyncadd (%p1758_p7), %s182_s20, 4294961024  ;;  %p1759_p6 = scmp.eq.s32.totalorder %s1473_s16, 0 }
  0x68   : > { %1397 = dma.done.wait (%p1759_p6), [#allocation6], 12544   ;;  %p1760_p8 = pmov %p1759_p6 }
  0x69   : > { %v288_v0 = vld [vmem:[#allocation5 + $0x80] sm:$0xff]  ;;  %v289_v1 = vld [vmem:[#allocation5 + $0x88] sm:$0xff]  ;;  %v290_v11 = vld [vmem:[#allocation5 + $0x90] sm:$0xff]  ;;  %vm377_vm0 = vcmask 130048   ;;  %vm1427_vm1 = vmmov 0   ;;  %s1231_s29 = smul.u32 56, %s1590_s17 }
  0x6a   : > { %1399 = vsyncadd (%p1760_p8), [#allocation6], 4294954752  ;;  %v272_v2 = vld [vmem:[#allocation5] sm:$0xff]  ;;  %v1129_v3 = vpack.c.bf16 %v289_v1, %v288_v0  ;;  %v273_v4 = vld [vmem:[#allocation5 + $0x8] sm:$0xff]  ;;  %s807_s8 = scalar_lea.sflag [#allocation4], %s1590_s17  ;;  %p1761_p9 = scmp.ne.s32.totalorder %s1752_s24, 0 }
  0x6b   : > { %v320_v5 = vld [vmem:[#allocation5 + $0x180] sm:$0xff]  ;;  %v321_v6 = vld [vmem:[#allocation5 + $0x188] sm:$0xff]  ;;  %v1131_v7 = vpack.c.bf16 %v273_v4, %v272_v2  ;;  %v291_v13 = vld [vmem:[#allocation5 + $0x98] sm:$0xff]  ;;  %s1671_s6 = scalar_lea.vmem [#allocation7], %s1231_s29  ;;  %s814_s11 = smul.u32 (%p1761_p9), 7, %s1473_s16 }
  0x6c   : > { %v1161_v8 = vpack.c.bf16 %v321_v6, %v320_v5  ;;  %v304_v9 = vld [vmem:[#allocation5 + $0x100] sm:$0xff]  ;;  %v305_v10 = vld [vmem:[#allocation5 + $0x108] sm:$0xff]  ;;  %1130 = vmatprep.subr.bf16.mxu0 %v1129_v3  ;;  %v274_v14 = vld [vmem:[#allocation5 + $0x10] sm:$0xff]  ;;  %v1133_v16 = vpack.c.bf16 %v291_v13, %v290_v11 }
  0x6d   : > { %v1163_v12 = vpack.c.bf16 %v305_v10, %v304_v9  ;;  %v275_v15 = vld [vmem:[#allocation5 + $0x18] sm:$0xff]  ;;  %1132 = vmatpush3.bf16.msra.mxu0 %v1131_v7  ;;  %v322_v18 = vld [vmem:[#allocation5 + $0x190] sm:$0xff]  ;;  %v292_v23 = vld [vmem:[#allocation5 + $0xa0] sm:$0xff]  ;;  %s815_s30 = ssub.s32 (%p1761_p9), 13, %s814_s11 }
  0x6e   : > { %1162 = vmatprep.subr.bf16.mxu1 %v1161_v8  ;;  %v1135_v17 = vpack.c.bf16 %v275_v15, %v274_v14  ;;  %v323_v19 = vld [vmem:[#allocation5 + $0x198] sm:$0xff]  ;;  %v306_v20 = vld [vmem:[#allocation5 + $0x110] sm:$0xff]  ;;  %v293_v24 = vld [vmem:[#allocation5 + $0xa8] sm:$0xff]  ;;  %1134 = vmatprep.subr.bf16.mxu0 %v1133_v16  ;;  %p816_p10 = scmp.lt.s32.totalorder (%p1761_p9), %s815_s30, 7 }
  0x6f   : > { %1164 = vmatpush3.bf16.msra.mxu1 %v1163_v12  ;;  %v1165_v21 = vpack.c.bf16 %v323_v19, %v322_v18  ;;  %v307_v22 = vld [vmem:[#allocation5 + $0x118] sm:$0xff]  ;;  %v1137_v26 = vpack.c.bf16 %v293_v24, %v292_v23  ;;  %v276_v27 = vld [vmem:[#allocation5 + $0x20] sm:$0xff]  ;;  %v277_v28 = vld [vmem:[#allocation5 + $0x28] sm:$0xff] }
  0x70   : > { %v1167_v25 = vpack.c.bf16 %v307_v22, %v306_v20  ;;  %v324_v29 = vld [vmem:[#allocation5 + $0x1a0] sm:$0xff]  ;;  %v325_v30 = vld [vmem:[#allocation5 + $0x1a8] sm:$0xff]  ;;  %v1139_v33 = vpack.c.bf16 %v277_v28, %v276_v27  ;;  %v294_v35 = vld [vmem:[#allocation5 + $0xb0] sm:$0xff] }
  0x71   : > { %1166 = vmatprep.subr.bf16.mxu1 %v1165_v21  ;;  %v308_v31 = vld [vmem:[#allocation5 + $0x120] sm:$0xff]  ;;  %v309_v32 = vld [vmem:[#allocation5 + $0x128] sm:$0xff]  ;;  %1136 = vmatpush3.bf16.msra.mxu0 %v1135_v17  ;;  %v1169_v34 = vpack.c.bf16 %v325_v30, %v324_v29  ;;  %v295_v36 = vld [vmem:[#allocation5 + $0xb8] sm:$0xff] }
  0x72   : > { %v278_v37 = vld [vmem:[#allocation5 + $0x30] sm:$0xff]  ;;  %1138 = vmatprep.subr.bf16.mxu0 %v1137_v26  ;;  %v1171_v38 = vpack.c.bf16 %v309_v32, %v308_v31  ;;  %v1141_v39 = vpack.c.bf16 %v295_v36, %v294_v35  ;;  %v279_v40 = vld [vmem:[#allocation5 + $0x38] sm:$0xff]  ;;  %v296_v46 = vld [vmem:[#allocation5 + $0xc0] sm:$0xff] }
  0x73   : > { %1168 = vmatpush3.bf16.msra.mxu1 %v1167_v25  ;;  %v326_v41 = vld [vmem:[#allocation5 + $0x1b0] sm:$0xff]  ;;  %v327_v42 = vld [vmem:[#allocation5 + $0x1b8] sm:$0xff]  ;;  %v297_v47 = vld [vmem:[#allocation5 + $0xc8] sm:$0xff]  ;;  %v1143_v48 = vpack.c.bf16 %v279_v40, %v278_v37 }
  0x74   : > { %1170 = vmatprep.subr.bf16.mxu1 %v1169_v34  ;;  %v1173_v43 = vpack.c.bf16 %v327_v42, %v326_v41  ;;  %v310_v44 = vld [vmem:[#allocation5 + $0x130] sm:$0xff]  ;;  %v311_v45 = vld [vmem:[#allocation5 + $0x138] sm:$0xff]  ;;  %v328_v49 = vld [vmem:[#allocation5 + $0x1c0] sm:$0xff]  ;;  %v1145_v52 = vpack.c.bf16 %v297_v47, %v296_v46 }
  0x75   : > { %1140 = vmatpush3.bf16.msra.mxu0 %v1139_v33  ;;  %v329_v50 = vld [vmem:[#allocation5 + $0x1c8] sm:$0xff]  ;;  %v1175_v51 = vpack.c.bf16 %v311_v45, %v310_v44  ;;  %v280_v53 = vld [vmem:[#allocation5 + $0x40] sm:$0xff]  ;;  %v298_v58 = vld [vmem:[#allocation5 + $0xd0] sm:$0xff] }
  0x76   : > { %1142 = vmatprep.subr.bf16.mxu0 %v1141_v39  ;;  %v281_v54 = vld [vmem:[#allocation5 + $0x48] sm:$0xff]  ;;  %v312_v55 = vld [vmem:[#allocation5 + $0x140] sm:$0xff]  ;;  %v1177_v56 = vpack.c.bf16 %v329_v50, %v328_v49  ;;  %v299_v59 = vld [vmem:[#allocation5 + $0xd8] sm:$0xff] }
  0x77   : > { %1172 = vmatpush3.bf16.msra.mxu1 %v1171_v38  ;;  %v313_v57 = vld [vmem:[#allocation5 + $0x148] sm:$0xff]  ;;  %v330_v60 = vld [vmem:[#allocation5 + $0x1d0] sm:$0xff]  ;;  %v331_v61 = vld [vmem:[#allocation5 + $0x1d8] sm:$0xff]  ;;  %v1147_v62 = vpack.c.bf16 %v281_v54, %v280_v53  ;;  %v1149_v0 = vpack.c.bf16 %v299_v59, %v298_v58 }
  0x78   : > { %1174 = vmatprep.subr.bf16.mxu1 %v1173_v43  ;;  %v1179_v63 = vpack.c.bf16 %v313_v57, %v312_v55  ;;  %v282_v1 = vld [vmem:[#allocation5 + $0x50] sm:$0xff]  ;;  %v283_v2 = vld [vmem:[#allocation5 + $0x58] sm:$0xff]  ;;  %v1181_v4 = vpack.c.bf16 %v331_v61, %v330_v60  ;;  %v300_v6 = vld [vmem:[#allocation5 + $0xe0] sm:$0xff] }
  0x79   : > { %1144 = vmatpush3.bf16.msra.mxu0 %v1143_v48  ;;  %v314_v3 = vld [vmem:[#allocation5 + $0x150] sm:$0xff]  ;;  %v315_v5 = vld [vmem:[#allocation5 + $0x158] sm:$0xff]  ;;  %v301_v7 = vld [vmem:[#allocation5 + $0xe8] sm:$0xff]  ;;  %v1151_v10 = vpack.c.bf16 %v283_v2, %v282_v1 }
  0x7a   : > { %1146 = vmatprep.subr.bf16.mxu0 %v1145_v52  ;;  %v332_v8 = vld [vmem:[#allocation5 + $0x1e0] sm:$0xff]  ;;  %v333_v9 = vld [vmem:[#allocation5 + $0x1e8] sm:$0xff]  ;;  %v1183_v13 = vpack.c.bf16 %v315_v5, %v314_v3  ;;  %v1153_v14 = vpack.c.bf16 %v301_v7, %v300_v6  ;;  %v302_v19 = vld [vmem:[#allocation5 + $0xf0] sm:$0xff]  ;;  %v1426_v52 = vmov 0.0|0.0  }
  0x7b   : > { %1176 = vmatpush3.bf16.msra.mxu1 %v1175_v51  ;;  %v284_v11 = vld [vmem:[#allocation5 + $0x60] sm:$0xff]  ;;  %v285_v15 = vld [vmem:[#allocation5 + $0x68] sm:$0xff]  ;;  %v1185_v18 = vpack.c.bf16 %v333_v9, %v332_v8  ;;  %v303_v20 = vld [vmem:[#allocation5 + $0xf8] sm:$0xff] }
  0x7c   : > { %1178 = vmatprep.subr.bf16.mxu1 %v1177_v56  ;;  %v224_v12 = vld [vmem:[%s1594_s27 + $0x8] sm:$0xff]  ;;  %v317_v17 = vld [vmem:[#allocation5 + $0x168] sm:$0xff]  ;;  %v334_v22 = vld [vmem:[#allocation5 + $0x1f0] sm:$0xff]  ;;  %v1155_v24 = vpack.c.bf16 %v285_v15, %v284_v11  ;;  %v1157_v26 = vpack.c.bf16 %v303_v20, %v302_v19 }
  0x7d   : > { %1148 = vmatpush3.bf16.msra.mxu0 %v1147_v62  ;;  %v316_v16 = vld [vmem:[#allocation5 + $0x160] sm:$0xff]  ;;  %463 = vmatprep.mubr.f32.mxu0 %v224_v12  ;;  %v226_v21 = vld [vmem:[%s1594_s27 + $0x18] sm:$0xff]  ;;  %v335_v23 = vld [vmem:[#allocation5 + $0x1f8] sm:$0xff] }
  0x7e   : > { %1150 = vmatprep.subr.bf16.mxu0 %v1149_v0  ;;  %563 = vmatprep.mubr.f32.mxu1 %v226_v21  ;;  %v1187_v25 = vpack.c.bf16 %v317_v17, %v316_v16  ;;  %v286_v27 = vld [vmem:[#allocation5 + $0x70] sm:$0xff]  ;;  %v287_v28 = vld [vmem:[#allocation5 + $0x78] sm:$0xff]  ;;  %v1189_v30 = vpack.c.bf16 %v335_v23, %v334_v22  ;;  %v352_v32 = vld [vmem:[#allocation5 + $0x280] sm:$0xff] }
  0x7f   : > { %1180 = vmatpush3.bf16.msra.mxu1 %v1179_v63  ;;  %v318_v29 = vld [vmem:[#allocation5 + $0x170] sm:$0xff]  ;;  %v319_v31 = vld [vmem:[#allocation5 + $0x178] sm:$0xff]  ;;  %v353_v33 = vld [vmem:[#allocation5 + $0x288] sm:$0xff]  ;;  %v1159_v34 = vpack.c.bf16 %v287_v28, %v286_v27 }
  0x80   : > { %1182 = vmatprep.subr.bf16.mxu1 %v1181_v4  ;;  %v1191_v35 = vpack.c.bf16 %v319_v31, %v318_v29  ;;  %v1193_v36 = vpack.c.bf16 %v353_v33, %v352_v32  ;;  %v336_v37 = vld [vmem:[#allocation5 + $0x200] sm:$0xff]  ;;  %v337_v38 = vld [vmem:[#allocation5 + $0x208] sm:$0xff]  ;;  %v354_v39 = vld [vmem:[#allocation5 + $0x290] sm:$0xff] }
  0x81   : > { %1152 = vmatpush3.bf16.msra.mxu0 %v1151_v10  ;;  %v355_v40 = vld [vmem:[#allocation5 + $0x298] sm:$0xff]  ;;  %v368_v41 = vld [vmem:[#allocation5 + $0x300] sm:$0xff]  ;;  %v369_v42 = vld [vmem:[#allocation5 + $0x308] sm:$0xff]  ;;  %v1195_v44 = vpack.c.bf16 %v337_v38, %v336_v37 }
  0x82   : > { %1154 = vmatprep.subr.bf16.mxu0 %v1153_v14  ;;  %v223_v43 = vld [vmem:[%s1594_s27] sm:$0xff]  ;;  %v225_v45 = vld [vmem:[%s1594_s27 + $0x10] sm:$0xff]  ;;  %v1197_v46 = vpack.c.bf16 %v355_v40, %v354_v39  ;;  %v1226_v53 = vpack.c.bf16 %v369_v42, %v368_v41  ;;  %v230_v56 = vld [vmem:[%s1594_s27 + $0x38] sm:$0xff] }
  0x83   : > { %1184 = vmatpush3.bf16.msra.mxu1 %v1183_v13  ;;  %v338_v47 = vld [vmem:[#allocation5 + $0x210] sm:$0xff]  ;;  %v339_v48 = vld [vmem:[#allocation5 + $0x218] sm:$0xff]  ;;  %v356_v50 = vld [vmem:[#allocation5 + $0x2a0] sm:$0xff] }
  0x84   : > { %1186 = vmatprep.subr.bf16.mxu1 %v1185_v18  ;;  %v231_v49 = vld [vmem:[%s1594_s27 + $0x40] sm:$0xff]  ;;  %v357_v51 = vld [vmem:[#allocation5 + $0x2a8] sm:$0xff]  ;;  %v1199_v55 = vpack.c.bf16 %v339_v48, %v338_v47  ;;  %v232_v58 = vld [vmem:[%s1594_s27 + $0x48] sm:$0xff] }
  0x85   : > { %1156 = vmatpush3.bf16.msra.mxu0 %v1155_v24  ;;  %v233_v54 = vld [vmem:[%s1594_s27 + $0x50] sm:$0xff]  ;;  %v1201_v57 = vpack.c.bf16 %v357_v51, %v356_v50  ;;  %v238_v61 = vld [vmem:[%s1594_s27 + $0x78] sm:$0xff]  ;;  %v359_v63 = vld [vmem:[#allocation5 + $0x2b8] sm:$0xff]  ;;  %v1428_v50 = vmov 0.0  }
  0x86   : > { %1158 = vmatprep.subr.bf16.mxu0 %v1157_v26  ;;  %v340_v59 = vld [vmem:[#allocation5 + $0x220] sm:$0xff]  ;;  %v341_v60 = vld [vmem:[#allocation5 + $0x228] sm:$0xff]  ;;  %v358_v62 = vld [vmem:[#allocation5 + $0x2b0] sm:$0xff] }
  0x87   : > { %1188 = vmatpush3.bf16.msra.mxu1 %v1187_v25  ;;  %v240_v0 = vld [vmem:[%s1594_s27 + $0x88] sm:$0xff]  ;;  %v1203_v1 = vpack.c.bf16 %v341_v60, %v340_v59  ;;  %v237_v2 = vld [vmem:[%s1594_s27 + $0x70] sm:$0xff]  ;;  %v1205_v3 = vpack.c.bf16 %v359_v63, %v358_v62  ;;  %v239_v4 = vld [vmem:[%s1594_s27 + $0x80] sm:$0xff] }
  0x88   : > { %1190 = vmatprep.subr.bf16.mxu1 %v1189_v30  ;;  %v342_v5 = vld [vmem:[#allocation5 + $0x230] sm:$0xff]  ;;  %v343_v6 = vld [vmem:[#allocation5 + $0x238] sm:$0xff]  ;;  %v245_v7 = vld [vmem:[%s1594_s27 + $0xb0] sm:$0xff] }
  0x89   : > { %1160 = vmatpush3.bf16.msra.mxu0 %v1159_v34  ;;  %v360_v8 = vld [vmem:[#allocation5 + $0x2c0] sm:$0xff]  ;;  %v361_v9 = vld [vmem:[#allocation5 + $0x2c8] sm:$0xff]  ;;  %v247_v10 = vld [vmem:[%s1594_s27 + $0xc0] sm:$0xff]  ;;  %v1207_v11 = vpack.c.bf16 %v343_v6, %v342_v5 }
  0x8a   : > { %1194 = vmatprep.subr.bf16.mxu0 %v1193_v36  ;;  %v244_v12 = vld [vmem:[%s1594_s27 + $0xa8] sm:$0xff]  ;;  %v1209_v13 = vpack.c.bf16 %v361_v9, %v360_v8  ;;  %v246_v14 = vld [vmem:[%s1594_s27 + $0xb8] sm:$0xff]  ;;  %v251_v22 = vld [vmem:[%s1594_s27 + $0xe0] sm:$0xff] }
  0x8b   : > { %1192 = vmatpush3.bf16.msra.mxu1 %v1191_v35  ;;  %v344_v15 = vld [vmem:[#allocation5 + $0x240] sm:$0xff]  ;;  %v345_v16 = vld [vmem:[#allocation5 + $0x248] sm:$0xff]  ;;  %v362_v18 = vld [vmem:[#allocation5 + $0x2d0] sm:$0xff] }
  0x8c   : > { %1225 = vmatprep.subr.bf16.mxu1 %v1426_v52  ;;  %464 = vmatmul.mubr.f32.vlgmr.msra.gmra.mrb[0].mxu0 %v223_v43  ;;  %v252_v17 = vld [vmem:[%s1594_s27 + $0xe8] sm:$0xff]  ;;  %v254_v20 = vld [vmem:[%s1594_s27 + $0xf8] sm:$0xff]  ;;  %v1211_v21 = vpack.c.bf16 %v345_v16, %v344_v15  ;;  %v253_v24 = vld [vmem:[%s1594_s27 + $0xf0] sm:$0xff] }
  0x8d   : > { %1196 = vmatpush3.bf16.msra.mxu0 %v1195_v44  ;;  %468 = vmatprep.mubr.f32.mxu0 %v231_v49  ;;  %v363_v19 = vld [vmem:[#allocation5 + $0x2d8] sm:$0xff]  ;;  %v346_v25 = vld [vmem:[#allocation5 + $0x250] sm:$0xff]  ;;  %v364_v28 = vld [vmem:[#allocation5 + $0x2e0] sm:$0xff] }
  0x8e   : > { %564 = vmatmul.mubr.f32.vlgmr.msra.gmra.mrb[0].mxu1 %v225_v45  ;;  %1198 = vmatprep.subr.bf16.mxu0 %v1197_v46  ;;  %v1213_v23 = vpack.c.bf16 %v363_v19, %v362_v18  ;;  %v347_v26 = vld [vmem:[#allocation5 + $0x258] sm:$0xff]  ;;  %v365_v29 = vld [vmem:[#allocation5 + $0x2e8] sm:$0xff]  ;;  %v348_v35 = vld [vmem:[#allocation5 + $0x260] sm:$0xff] }
  0x8f   : > { %568 = vmatprep.mubr.f32.mxu1 %v233_v54  ;;  %1227 = vmatpush3.bf16.msra.mxu1 %v1226_v53  ;;  %v259_v27 = vld [vmem:[%s1594_s27 + $0x120] sm:$0xff]  ;;  %v261_v30 = vld [vmem:[%s1594_s27 + $0x130] sm:$0xff]  ;;  %v1215_v31 = vpack.c.bf16 %v347_v26, %v346_v25  ;;  %v258_v32 = vld [vmem:[%s1594_s27 + $0x118] sm:$0xff]  ;;  %v1217_v33 = vpack.c.bf16 %v365_v29, %v364_v28 }
  0x90   : > { %469 = vmatmul.mubr.f32.gmra.mrb[2].mxu0 %v230_v56  ;;  %v260_v34 = vld [vmem:[%s1594_s27 + $0x128] sm:$0xff]  ;;  %v349_v36 = vld [vmem:[#allocation5 + $0x268] sm:$0xff]  ;;  %v366_v38 = vld [vmem:[#allocation5 + $0x2f0] sm:$0xff] }
  0x91   : > { %1200 = vmatpush3.bf16.msra.mxu0 %v1199_v55  ;;  %473 = vmatprep.mubr.f32.mxu0 %v238_v61  ;;  %v266_v37 = vld [vmem:[%s1594_s27 + $0x158] sm:$0xff]  ;;  %v367_v39 = vld [vmem:[#allocation5 + $0x2f8] sm:$0xff]  ;;  %v1219_v41 = vpack.c.bf16 %v349_v36, %v348_v35  ;;  %v265_v42 = vld [vmem:[%s1594_s27 + $0x150] sm:$0xff] }
  0x92   : > { %569 = vmatmul.mubr.f32.gmra.mrb[2].mxu1 %v232_v58  ;;  %1202 = vmatprep.subr.bf16.mxu0 %v1201_v57  ;;  %v268_v40 = vld [vmem:[%s1594_s27 + $0x168] sm:$0xff]  ;;  %v1221_v43 = vpack.c.bf16 %v367_v39, %v366_v38  ;;  %v267_v44 = vld [vmem:[%s1594_s27 + $0x160] sm:$0xff]  ;;  %v229_v49 = vld [vmem:[%s1594_s27 + $0x30] sm:$0xff] }
  0x93   : > { %573 = vmatprep.mubr.f32.mxu1 %v240_v0  ;;  %v350_v45 = vld [vmem:[#allocation5 + $0x270] sm:$0xff]  ;;  %v351_v46 = vld [vmem:[#allocation5 + $0x278] sm:$0xff]  ;;  %v241_v57 = vld [vmem:[%s1594_s27 + $0x90] sm:$0xff] }
  0x94   : > { %474 = vmatmul.mubr.f32.gmra.mrb[4].mxu0 %v237_v2  ;;  %v228_v47 = vld [vmem:[%s1594_s27 + $0x28] sm:$0xff]  ;;  %v1223_v48 = vpack.c.bf16 %v351_v46, %v350_v45  ;;  %v227_v51 = vld [vmem:[%s1594_s27 + $0x20] sm:$0xff]  ;;  %v234_v54 = vld [vmem:[%s1594_s27 + $0x58] sm:$0xff] }
  0x95   : > { %1204 = vmatpush3.bf16.msra.mxu0 %v1203_v1  ;;  %478 = vmatprep.mubr.f32.mxu0 %v245_v7  ;;  %v235_v52 = vld [vmem:[%s1594_s27 + $0x60] sm:$0xff]  ;;  %v236_v53 = vld [vmem:[%s1594_s27 + $0x68] sm:$0xff]  ;;  %v242_v55 = vld [vmem:[%s1594_s27 + $0x98] sm:$0xff] }
  0x96   : > { %574 = vmatmul.mubr.f32.gmra.mrb[4].mxu1 %v239_v4  ;;  %1206 = vmatprep.subr.bf16.mxu0 %v1205_v3  ;;  %v243_v56 = vld [vmem:[%s1594_s27 + $0xa0] sm:$0xff]  ;;  %v249_v58 = vld [vmem:[%s1594_s27 + $0xd0] sm:$0xff]  ;;  %v250_v59 = vld [vmem:[%s1594_s27 + $0xd8] sm:$0xff] }
  0x97   : > { %578 = vmatprep.mubr.f32.mxu1 %v247_v10  ;;  %v248_v60 = vld [vmem:[%s1594_s27 + $0xc8] sm:$0xff]  ;;  %v257_v62 = vld [vmem:[%s1594_s27 + $0x110] sm:$0xff]  ;;  %v255_v63 = vld [vmem:[%s1594_s27 + $0x100] sm:$0xff] }
  0x98   : > { %479 = vmatmul.mubr.f32.gmra.mrb[6].mxu0 %v244_v12  ;;  %v256_v61 = vld [vmem:[%s1594_s27 + $0x108] sm:$0xff]  ;;  %v263_v0 = vld [vmem:[%s1594_s27 + $0x140] sm:$0xff]  ;;  %v262_v2 = vld [vmem:[%s1594_s27 + $0x138] sm:$0xff] }
  0x99   : > { %1208 = vmatpush3.bf16.msra.mxu0 %v1207_v11  ;;  %483 = vmatprep.mubr.f32.mxu0 %v252_v17  ;;  %v264_v1 = vld [vmem:[%s1594_s27 + $0x148] sm:$0xff]  ;;  %v270_v3 = vld [vmem:[%s1594_s27 + $0x178] sm:$0xff]  ;;  %v271_v4 = vld [vmem:[%s1594_s27 + $0x180] sm:$0xff] }
  0x9a   : > { %579 = vmatmul.mubr.f32.gmra.mrb[6].mxu1 %v246_v14  ;;  %1210 = vmatprep.subr.bf16.mxu0 %v1209_v13  ;;  %v269_v5 = vld [vmem:[%s1594_s27 + $0x170] sm:$0xff]  ;;  %v920_v7 = vld [vmem:[%s1745_s2] ss:$0 sm:$0xff] }
  0x9b   : > { %583 = vmatprep.mubr.f32.mxu1 %v254_v20 }
  0x9c   : > { %484 = vmatmul.mubr.f32.gmra.mrb[8].mxu0 %v251_v22 }
  0x9d   : > { %1212 = vmatpush3.bf16.msra.mxu0 %v1211_v21  ;;  %488 = vmatprep.mubr.f32.mxu0 %v259_v27 }
  0x9e   : > { %584 = vmatmul.mubr.f32.gmra.mrb[8].mxu1 %v253_v24  ;;  %1214 = vmatprep.subr.bf16.mxu0 %v1213_v23 }
  0x9f   : > { %588 = vmatprep.mubr.f32.mxu1 %v261_v30 }
  0xa0   : > { %489 = vmatmul.mubr.f32.gmra.mrb[10].mxu0 %v258_v32 }
  0xa1   : > { %1216 = vmatpush3.bf16.msra.mxu0 %v1215_v31  ;;  %493 = vmatprep.mubr.f32.mxu0 %v266_v37 }
  0xa2   : > { %589 = vmatmul.mubr.f32.gmra.mrb[10].mxu1 %v260_v34  ;;  %1218 = vmatprep.subr.bf16.mxu0 %v1217_v33 }
  0xa3   : > { %593 = vmatprep.mubr.f32.mxu1 %v268_v40 }
  0xa4   : > { %494 = vmatmul.mubr.f32.gmra.mrb[12].mxu0 %v265_v42 }
  0xa5   : > { %1220 = vmatpush3.bf16.msra.mxu0 %v1219_v41  ;;  %663 = vmatprep.mubr.f32.mxu0 %v228_v47 }
  0xa6   : > { %594 = vmatmul.mubr.f32.gmra.mrb[12].mxu1 %v267_v44  ;;  %1222 = vmatprep.subr.bf16.mxu0 %v1221_v43 }
  0xa7   : > { %1108 = vmatprep.mubr.msk.f32.mxu1 %vm1427_vm1, %v1428_v50 }
  0xa9   : > { %1224 = vmatpush3.bf16.msra.mxu0 %v1223_v48 }
  0xaa   : > { %1109 = vmatmul.mubr.msk.f32.vlgmr.msra.gmra.mrb[14].mxu1 %vm377_vm0, %v229_v49 }
  0xab   : > { %1111 = vmatprep.mubr.msk.f32.mxu1 %vm1427_vm1, %v1428_v50 }
  0xac   : > { %664 = vmatmul.mubr.f32.vlgmr.msra.gmra.mrb[14].mxu0 %v227_v51 }
  0xad   : > { %668 = vmatprep.mubr.f32.mxu0 %v235_v52 }
  0xae   : > { %1112 = vmatmul.mubr.msk.f32.gmra.mrb[16].mxu1 %vm377_vm0, %v236_v53 }
  0xaf   : > { %1114 = vmatprep.mubr.msk.f32.mxu1 %vm1427_vm1, %v1428_v50 }
  0xb0   : > { %669 = vmatmul.mubr.f32.gmra.mrb[16].mxu0 %v234_v54 }
  0xb1   : > { %673 = vmatprep.mubr.f32.mxu0 %v242_v55 }
  0xb2   : > { %1115 = vmatmul.mubr.msk.f32.gmra.mrb[18].mxu1 %vm377_vm0, %v243_v56 }
  0xb3   : > { %1117 = vmatprep.mubr.msk.f32.mxu1 %vm1427_vm1, %v1428_v50 }
  0xb4   : > { %674 = vmatmul.mubr.f32.gmra.mrb[18].mxu0 %v241_v57 }
  0xb5   : > { %678 = vmatprep.mubr.f32.mxu0 %v249_v58 }
  0xb6   : > { %1118 = vmatmul.mubr.msk.f32.gmra.mrb[20].mxu1 %vm377_vm0, %v250_v59 }
  0xb7   : > { %1120 = vmatprep.mubr.msk.f32.mxu1 %vm1427_vm1, %v1428_v50 }
  0xb8   : > { %679 = vmatmul.mubr.f32.gmra.mrb[20].mxu0 %v248_v60 }
  0xb9   : > { %683 = vmatprep.mubr.f32.mxu0 %v256_v61 }
  0xba   : > { %1121 = vmatmul.mubr.msk.f32.gmra.mrb[22].mxu1 %vm377_vm0, %v257_v62 }
  0xbb   : > { %1123 = vmatprep.mubr.msk.f32.mxu1 %vm1427_vm1, %v1428_v50 }
  0xbc   : > { %684 = vmatmul.mubr.f32.gmra.mrb[22].mxu0 %v255_v63 }
  0xbd   : > { %688 = vmatprep.mubr.f32.mxu0 %v263_v0 }
  0xbe   : > { %1124 = vmatmul.mubr.msk.f32.gmra.mrb[24].mxu1 %vm377_vm0, %v264_v1 }
  0xbf   : > { %1126 = vmatprep.mubr.msk.f32.mxu1 %vm1427_vm1, %v1428_v50 }
  0xc0   : > { %689 = vmatmul.mubr.f32.gmra.mrb[24].mxu0 %v262_v2 }
  0xc1   : > { %693 = vmatprep.mubr.f32.mxu0 %v270_v3 }
  0xc2   : > { %1127 = vmatmul.mubr.msk.f32.gmra.mrb[26].mxu1 %vm377_vm0, %v271_v4 }
  0xc4   : > { %694 = vmatmul.mubr.f32.gmra.mrb[26].mxu0 %v269_v5 }
 0x15f   : > { %v968_v6 = vpop.f32.mrb[0].mxu0 }
 0x160   : > { %v969_v8 = vpop.f32.mrb[1].mxu0 }
 0x161   : > { %v1021_v9 = vpop.f32.mrb[0].mxu1  ;;  %v970_v10 = vadd.f32 %v969_v8, %v968_v6 }
 0x162   : > { %v1022_v11 = vpop.f32.mrb[1].mxu1 }
 0x163   : > { %v1023_v12 = vadd.f32 %v1022_v11, %v1021_v9  ;;  %v466_v13 = vadd.f32 %v970_v10, %v920_v7  ;;  %v971_v14 = vpop.f32.mrb[2].mxu0 }
 0x164   : > { %v972_v15 = vpop.f32.mrb[3].mxu0 }
 0x165   : > { %v1024_v16 = vpop.f32.mrb[2].mxu1  ;;  %v566_v17 = vadd.f32 %v1023_v12, %v466_v13  ;;  %v973_v18 = vadd.f32 %v972_v15, %v971_v14 }
 0x166   : > { %v1025_v19 = vpop.f32.mrb[3].mxu1 }
 0x167   : > { %v1026_v20 = vadd.f32 %v1025_v19, %v1024_v16  ;;  %v471_v21 = vadd.f32 %v973_v18, %v920_v7  ;;  %v974_v22 = vpop.f32.mrb[4].mxu0 }
 0x168   : > { %v975_v23 = vpop.f32.mrb[5].mxu0 }
 0x169   : > { %v1027_v24 = vpop.f32.mrb[4].mxu1  ;;  %v571_v25 = vadd.f32 %v1026_v20, %v471_v21  ;;  %v976_v26 = vadd.f32 %v975_v23, %v974_v22 }
 0x16a   : > { %v1028_v27 = vpop.f32.mrb[5].mxu1 }
 0x16b   : > { %v1029_v28 = vadd.f32 %v1028_v27, %v1027_v24  ;;  %v476_v29 = vadd.f32 %v976_v26, %v920_v7  ;;  %v977_v30 = vpop.f32.mrb[6].mxu0 }
 0x16c   : > { %v978_v31 = vpop.f32.mrb[7].mxu0 }
 0x16d   : > { %v1030_v32 = vpop.f32.mrb[6].mxu1  ;;  %v576_v33 = vadd.f32 %v1029_v28, %v476_v29  ;;  %v979_v34 = vadd.f32 %v978_v31, %v977_v30 }
 0x16e   : > { %v1031_v35 = vpop.f32.mrb[7].mxu1 }
 0x16f   : > { %v1032_v36 = vadd.f32 %v1031_v35, %v1030_v32  ;;  %v481_v37 = vadd.f32 %v979_v34, %v920_v7  ;;  %v980_v38 = vpop.f32.mrb[8].mxu0 }
 0x170   : > { %v981_v39 = vpop.f32.mrb[9].mxu0 }
 0x171   : > { %v1033_v40 = vpop.f32.mrb[8].mxu1  ;;  %v581_v41 = vadd.f32 %v1032_v36, %v481_v37  ;;  %v982_v42 = vadd.f32 %v981_v39, %v980_v38 }
 0x172   : > { %v1034_v43 = vpop.f32.mrb[9].mxu1 }
 0x173   : > { %v1035_v44 = vadd.f32 %v1034_v43, %v1033_v40  ;;  %v486_v45 = vadd.f32 %v982_v42, %v920_v7  ;;  %v983_v46 = vpop.f32.mrb[10].mxu0 }
 0x174   : > { %v984_v47 = vpop.f32.mrb[11].mxu0 }
 0x175   : > { %v1036_v48 = vpop.f32.mrb[10].mxu1  ;;  %v586_v49 = vadd.f32 %v1035_v44, %v486_v45  ;;  %v985_v50 = vadd.f32 %v984_v47, %v983_v46 }
 0x176   : > { %v1037_v51 = vpop.f32.mrb[11].mxu1 }
 0x177   : > { %v1038_v52 = vadd.f32 %v1037_v51, %v1036_v48  ;;  %v491_v53 = vadd.f32 %v985_v50, %v920_v7  ;;  %v986_v54 = vpop.f32.mrb[12].mxu0 }
 0x178   : > { %v987_v55 = vpop.f32.mrb[13].mxu0 }
 0x179   : > { %v1039_v56 = vpop.f32.mrb[12].mxu1  ;;  %v591_v57 = vadd.f32 %v1038_v52, %v491_v53  ;;  %v988_v58 = vadd.f32 %v987_v55, %v986_v54 }
 0x17a   : > { %v1040_v59 = vpop.f32.mrb[13].mxu1 }
 0x17b   : > { %v1041_v60 = vadd.f32 %v1040_v59, %v1039_v56  ;;  %v496_v61 = vadd.f32 %v988_v58, %v920_v7 }
 0x17d   : > { %v765_v62 = vpop.f32.mrb[14].mxu1  ;;  %v596_v63 = vadd.f32 %v1041_v60, %v496_v61 }
 0x17e   : > { %v1110_v0 = vpop.f32.mrb[15].mxu1 }
 0x17f   : > { %v1074_v1 = vpop.f32.mrb[14].mxu0 }
 0x180   : > { %v1075_v2 = vpop.f32.mrb[15].mxu0 }
 0x181   : > { %v770_v3 = vpop.f32.mrb[16].mxu1  ;;  %v1076_v4 = vadd.f32 %v1075_v2, %v1074_v1 }
 0x182   : > { %v1113_v5 = vpop.f32.mrb[17].mxu1 }
 0x183   : > { %v1077_v6 = vpop.f32.mrb[16].mxu0  ;;  %v666_v8 = vadd.f32 %v1076_v4, %v566_v17 }
 0x184   : > { %v1078_v9 = vpop.f32.mrb[17].mxu0 }
 0x185   : > { %v775_v10 = vpop.f32.mrb[18].mxu1  ;;  %v766_v11 = vadd.f32 %v765_v62, %v666_v8  ;;  %v1079_v12 = vadd.f32 %v1078_v9, %v1077_v6 }
 0x186   : > { %v1116_v13 = vpop.f32.mrb[19].mxu1 }
 0x187   : > { %799 = vst [vmem:[%s1671_s6] sm:$0xff] %v766_v11  ;;  %v1080_v7 = vpop.f32.mrb[18].mxu0  ;;  %v671_v14 = vadd.f32 %v1079_v12, %v571_v25 }
 0x188   : > { %v1081_v15 = vpop.f32.mrb[19].mxu0 }
 0x189   : > { %v780_v16 = vpop.f32.mrb[20].mxu1  ;;  %v771_v18 = vadd.f32 %v770_v3, %v671_v14  ;;  %v1082_v19 = vadd.f32 %v1081_v15, %v1080_v7 }
 0x18a   : > { %v1119_v20 = vpop.f32.mrb[21].mxu1 }
 0x18b   : > { %800 = vst [vmem:[%s1671_s6 + $0x8] sm:$0xff] %v771_v18  ;;  %v1083_v17 = vpop.f32.mrb[20].mxu0  ;;  %v676_v21 = vadd.f32 %v1082_v19, %v576_v33 }
 0x18c   : > { %v1084_v22 = vpop.f32.mrb[21].mxu0 }
 0x18d   : > { %v785_v23 = vpop.f32.mrb[22].mxu1  ;;  %v776_v24 = vadd.f32 %v775_v10, %v676_v21  ;;  %v1085_v26 = vadd.f32 %v1084_v22, %v1083_v17 }
 0x18e   : > { %v1122_v27 = vpop.f32.mrb[23].mxu1 }
 0x18f   : > { %801 = vst [vmem:[%s1671_s6 + $0x10] sm:$0xff] %v776_v24  ;;  %v1086_v28 = vpop.f32.mrb[22].mxu0  ;;  %v681_v29 = vadd.f32 %v1085_v26, %v581_v41 }
 0x190   : > { %v1087_v30 = vpop.f32.mrb[23].mxu0 }
 0x191   : > { %v790_v25 = vpop.f32.mrb[24].mxu1  ;;  %v781_v31 = vadd.f32 %v780_v16, %v681_v29  ;;  %v1088_v32 = vadd.f32 %v1087_v30, %v1086_v28 }
 0x192   : > { %v1125_v34 = vpop.f32.mrb[25].mxu1 }
 0x193   : > { %802 = vst [vmem:[%s1671_s6 + $0x18] sm:$0xff] %v781_v31  ;;  %v1089_v35 = vpop.f32.mrb[24].mxu0  ;;  %v686_v36 = vadd.f32 %v1088_v32, %v586_v49 }
 0x194   : > { %v1090_v33 = vpop.f32.mrb[25].mxu0 }
 0x195   : > { %v795_v37 = vpop.f32.mrb[26].mxu1  ;;  %v786_v38 = vadd.f32 %v785_v23, %v686_v36  ;;  %v1091_v39 = vadd.f32 %v1090_v33, %v1089_v35 }
 0x196   : > { %v1128_v40 = vpop.f32.mrb[27].mxu1 }
 0x197   : > { %803 = vst [vmem:[%s1671_s6 + $0x20] sm:$0xff] %v786_v38  ;;  %v1092_v42 = vpop.f32.mrb[26].mxu0  ;;  %v691_v43 = vadd.f32 %v1091_v39, %v591_v57 }
 0x198   : > { %v1093_v41 = vpop.f32.mrb[27].mxu0 }
 0x199   : > { %v791_v44 = vadd.f32 %v790_v25, %v691_v43  ;;  %v1094_v45 = vadd.f32 %v1093_v41, %v1092_v42  ;;  %813 = sbr.rel (!%p1761_p9) target bundleno = 444 (0x1bc), region = 44 }
 0x19b   : > { %804 = vst [vmem:[%s1671_s6 + $0x28] sm:$0xff] %v791_v44  ;;  %v696_v46 = vadd.f32 %v1094_v45, %v596_v63 }
 0x19d   : > { %v796_v47 = vadd.f32 %v795_v37, %v696_v46 }
 0x19f   : > { %805 = vst [vmem:[%s1671_s6 + $0x30] sm:$0xff] %v796_v47 }
 0x1a0   : > { %s1770_s30 = smov (!%p816_p10, %s815_s30), 7 }
 0x1a1   : > { %s1684_s4 = sshll.u32 %s1770_s30, 7 }
 0x1a2   : > { %s820_s5 = ssub.s32 896, %s1684_s4 }
 0x1a3   : > { %821 = vsyncadd %s807_s8, %s820_s5  ;;  %p929_p1 = scmp.ne.s32.totalorder %s1684_s4, 0  ;;  %s935_s24 = smul.u32 896, %s1473_s16 }
 0x1a4   : > { %s826_s28 = sshll.u32 %s1671_s6, 4  ;;  %s1429_s19 = smov [#allocation7]   ;;  %s1697_s28 = int_to_ptr.vmem [resolvable:$true] %s826_s28 }
 0x1a5   : > { %s1695_s9 = scalar_lea.hbm %s1746_s3, %s935_s24  ;;  %s1348_s10 = scalar_lea.vmem %s1697_s28, %s1684_s4 }
 0x1a6   : > { %p1349_p4 = scmp.ne.s32.totalorder %s1697_s28, %s1348_s10  ;;  %s1352_s20 = sshll.u32 %s1429_s19, 4  ;;  %s1353_s20 = int_to_ptr.vmem [resolvable:$false] %s1352_s20 }
 0x1a7   : > { %s1354_s16 = scalar_lea.vmem %s1353_s20, 1792  ;;  %p1355_p12 = scmp.lt.s32.totalorder %s1697_s28, %s1353_s20 }
 0x1a8   : > { %p1350_p5 = pnand %p1349_p4, %p929_p1  ;;  %p1356_p2 = scmp.lt.s32.totalorder %s1354_s16, %s1348_s10 }
 0x1aa   : > { %p1351_p11 = pneg %p1350_p5  ;;  %p1357_p3 = por %p1356_p2, %p1355_p12 }
 0x1ac   : > { %p1358_p13 = pnand %p1357_p3, %p1351_p11 }
 0x1ae   : > { %1361 = shalt.err (!%p1358_p13)
}
 0x1af   : > { %s1362_s27 = scalar_lea.hbm %s1695_s9, %s1684_s4  ;;  %s1366_s29 = scalar_lea.hbm %s1746_s3, 1664 }
 0x1b0   : > { %p1363_p7 = scmp.ne.s32.totalorder %s1695_s9, %s1362_s27  ;;  %p1367_p9 = scmp.lt.u32.totalorder %s1695_s9, %s1746_s3 }
 0x1b1   : > { %p1368_p10 = scmp.lt.u32.totalorder %s1366_s29, %s1362_s27  ;;  %p1370_p5 = scmp.lt.u32.totalorder %s1362_s27, %s1695_s9 }
 0x1b2   : > { %p1364_p6 = pnand %p1363_p7, %p929_p1 }
 0x1b3   : > { %p1369_p4 = por %p1368_p10, %p1367_p9 }
 0x1b4   : > { %p1365_p8 = pneg %p1364_p6 }
 0x1b5   : > { %p1371_p11 = por %p1370_p5, %p1369_p4 }
 0x1b7   : > { %p1372_p12 = pnand %p1371_p11, %p1365_p8 }
 0x1b9   : > { %1375 = shalt.err (!%p1372_p12)
}
 0x1ba   : > { %s1430_s30 = smov 128   ;;  %s1431_s5 = smov 8  }
 0x1bb   : > { %832 = dma.vmem_to_hbm [thread:$0]  (%p929_p1), %s1697_s28, %s1684_s4, %s1695_s9, %s807_s8, %s1430_s30, %s1430_s30, %s1431_s5  }
 0x1bc PF: > { %s841_s24 = sand.u32 1, %s1406_s12   ;;  %p1762_p2 = scmp.ne.s32.totalorder %s1753_s25, 0 }
 0x1bd   : > { %s842_s7 = scalar_lea.sflag [#allocation4], %s841_s24 }
 0x1be   : > { %p1243_p3 = pnand %p912_p0, %p1762_p2 }
 0x1c0   : > { %1401 = dma.done.wait (!%p1243_p3), %s842_s7, 896  }
 0x1c1   : > { %1403 = vsyncadd (!%p1243_p3), %s842_s7, 4294966400  ;;  %p17_p13 = scmp.ge.s32.totalorder %s1477_s18, 4   ;;  %s1763_s12 = smov %s1410_s13 }
 0x1c2   : > { %s1764_s13 = smov %s1414_s14  ;;  %s1765_s14 = smov %s1489_s21 }
 0x1c3   : > { %s1766_s15 = smov %s1477_s18  ;;  %19 = sbr.rel (!%p17_p13) target bundleno = 6 (0x6), region = 81 }
 0x1ca   :  { %847 = vsyncpa [#allocation3], 1 }
 0x1cb   :  { %849 = vsyncpa [#allocation3 + $0x1], 1 }
 0x1cc   :  { %850 = vsyncpa [#allocation6], 1 }
 0x1cd   :  { %851 = vsyncpa [#allocation4], 1 }
 0x1ce   :  { %853 = vsyncpa [#allocation4 + $0x1], 1 }

</bundles_post_ra>
